<compile_context>
chip_gen: v7x
topology: tpu7x:2x2x1
jax: 0.10.0
libtpu: 0.0.40
codegen_flags: <defaults>
</compile_context>

<pallas_src>
import functools

import jax
import jax.numpy as jnp
from jax.experimental import pallas as pl
from jax.experimental.pallas import tpu as pltpu

_LANES = 128
_DEFAULT_BATCH_TILE = 256
_MIN_PARALLEL_BATCH = 256   # batches >= this get split into >= 2 tiles (v7x)


def _cdiv(a, b):
    return (a + b - 1) // b


def _round_up(x, m):
    return _cdiv(x, m) * m


def _probe_single_buffer():
    # pipeline_mode=pl.Buffered(1) on constant-index specs; fall back cleanly
    # on jax versions without it.
    try:
        pl.BlockSpec((8, 128), lambda i, k: (0, 0), pipeline_mode=pl.Buffered(1))
        return True
    except Exception:
        return False


_HAS_SINGLE_BUFFER = _probe_single_buffer()


def _spec(block_shape, index_map, *, resident=False):
    """BlockSpec; resident=True -> single pipeline buffer (constant index)."""
    if resident and _HAS_SINGLE_BUFFER:
        return pl.BlockSpec(block_shape, index_map, pipeline_mode=pl.Buffered(1))
    return pl.BlockSpec(block_shape, index_map)


def _pick_tanh_dtype(weight_dtype):
    """bf16 tanh on v6e/v7x (bf16 EUP); f32 elsewhere (always correct)."""
    if jnp.dtype(weight_dtype) != jnp.dtype(jnp.bfloat16):
        return jnp.float32
    try:
        kind = jax.devices()[0].device_kind.lower()
    except Exception:
        kind = ""
    if any(tag in kind for tag in ("v6", "v7", "tpu7", "7x")):
        return jnp.bfloat16
    return jnp.float32


def _choose_batch_tiling(b, batch_tile):
    """Balanced batch tiles, 16-row aligned (bf16 sublane packing), bounded
    padding, and >= 2 tiles for large batches so the 'parallel' batch axis can
    shard across v7x's 2 TensorCores."""
    b16 = _round_up(b, 16)
    n_tiles = _cdiv(b16, batch_tile)
    if b16 >= _MIN_PARALLEL_BATCH:
        n_tiles = max(n_tiles, 2)
    tb = _round_up(_cdiv(b16, n_tiles), 16)
    return tb, tb * n_tiles


def _choose_k_split(input_dim, n_batch_tiles):
    """Stream w1 along K only in the single-batch-tile (serving) case, where a
    resident weight fill would be fully exposed. For multi-tile batches keep
    the weights resident (constant block index -> DMA'd once)."""
    if n_batch_tiles != 1:
        return 1
    for tk in (256, 128):
        if input_dim % tk == 0 and input_dim // tk >= 2:
            return input_dim // tk
    return 1


def _cls_head_kernel(x_ref, w1_ref, b1_ref, w2_ref, b2_ref, o_ref, *acc,
                     n_k, tanh_dtype):
    def epilogue(h_f32):
        # Bias add in f32 (VPU), tanh in bf16 on v6e/v7x (bf16 EUP) -- the
        # result is truncated to bf16 for the second MXU pass anyway.
        h = jnp.tanh((h_f32 + b1_ref[...]).astype(tanh_dtype))
        out = jnp.dot(h.astype(w2_ref.dtype), w2_ref[...],
                      preferred_element_type=jnp.float32)
        o_ref[...] = (out + b2_ref[...]).astype(o_ref.dtype)

    # no-op cast when the producer already emits bf16 features
    x = x_ref[...].astype(w1_ref.dtype)
    partial = jnp.dot(x, w1_ref[...], preferred_element_type=jnp.float32)

    if n_k == 1:
        # Resident-weight path: keep h in registers, no scratch round-trip.
        epilogue(partial)
    else:
        # K-split path: accumulate x@w1 over streamed (tk, inner) w1 slices.
        acc_ref, = acc
        k = pl.program_id(1)

        @pl.when(k == 0)
        def _():
            acc_ref[...] = jnp.zeros_like(acc_ref)

        acc_ref[...] += partial

        @pl.when(k == n_k - 1)
        def _():
            epilogue(acc_ref[...])


def _pallas_forward(x_padded, w1, b1, w2, b2, *, tb, n_k, tanh_dtype, out_dtype):
    bp, input_dim = x_padded.shape
    inner_dim = w1.shape[1]
    c_pad = w2.shape[1]
    n_i = bp // tb
    tk = input_dim // n_k
    grid = (n_i, n_k)

    kernel = functools.partial(_cls_head_kernel, n_k=n_k, tanh_dtype=tanh_dtype)

    w1_resident = (n_k == 1)
    # NOTE: the (1, inner)/(1, c_pad) bias blocks satisfy the (8,128) rule only
    # because the block equals the full array shape; do not tile the bias.
    in_specs = [
        _spec((tb, tk), lambda i, k: (i, k)),                            # x
        _spec((tk, inner_dim), lambda i, k: (k, 0), resident=w1_resident),  # w1
        _spec((1, inner_dim), lambda i, k: (0, 0), resident=True),      # b1
        _spec((inner_dim, c_pad), lambda i, k: (0, 0), resident=True),  # w2
        _spec((1, c_pad), lambda i, k: (0, 0), resident=True),          # b2
    ]
    out_spec = pl.BlockSpec((tb, c_pad), lambda i, k: (i, 0))

    scratch_shapes = []
    if n_k > 1:
        scratch_shapes.append(pltpu.VMEM((tb, inner_dim), jnp.float32))

    # ---- VMEM budget derived from the actual buffer set ---------------------
    resident_bufs = 1 if _HAS_SINGLE_BUFFER else 2
    w1_bufs = resident_bufs if w1_resident else 2
    vmem = (
        2 * tb * tk * x_padded.dtype.itemsize                    # x (double buf)
        + w1_bufs * tk * inner_dim * w1.dtype.itemsize           # w1
        + resident_bufs * inner_dim * b1.dtype.itemsize          # b1
        + resident_bufs * inner_dim * c_pad * w2.dtype.itemsize  # w2
        + resident_bufs * c_pad * b2.dtype.itemsize              # b2
        + 2 * tb * c_pad * jnp.dtype(out_dtype).itemsize         # out (double buf)
        + tb * inner_dim * 4                                     # acc / h spill
    )
    vmem_limit = int(min(max(vmem * 3 // 2 + (2 << 20), 4 << 20), 64 << 20))

    flops = 2 * bp * input_dim * inner_dim + 2 * bp * inner_dim * c_pad
    bytes_accessed = (
        x_padded.size * x_padded.dtype.itemsize
        + w1.size * w1.dtype.itemsize + b1.size * b1.dtype.itemsize
        + w2.size * w2.dtype.itemsize + b2.size * b2.dtype.itemsize
        + bp * c_pad * jnp.dtype(out_dtype).itemsize)

    return pl.pallas_call(
        kernel,
        out_shape=jax.ShapeDtypeStruct((bp, c_pad), out_dtype),
        grid_spec=pltpu.PrefetchScalarGridSpec(
            num_scalar_prefetch=0,
            grid=grid,
            in_specs=in_specs,
            out_specs=out_spec,
            scratch_shapes=scratch_shapes,
        ),
        compiler_params=pltpu.CompilerParams(
            dimension_semantics=("parallel", "arbitrary"),
            vmem_limit_bytes=vmem_limit,
        ),
        cost_estimate=pl.CostEstimate(
            flops=flops,
            transcendentals=bp * inner_dim,
            bytes_accessed=bytes_accessed,
        ),
    )(x_padded, w1, b1, w2, b2)


def make_bart_classification_head(w_dense, b_dense, w_out, b_out,
                                  *, weight_dtype=jnp.bfloat16,
                                  out_dtype=jnp.float32,
                                  batch_tile=_DEFAULT_BATCH_TILE):
    """One-time parameter prep (transpose / pad / cast) and a jitted
    `forward(features) -> [B, num_classes]` callable (f32 logits by default).

    PyTorch conventions: w_dense [inner, input], b_dense [inner],
    w_out [num_classes, inner], b_out [num_classes].
    """
    inner_dim, input_dim = w_dense.shape
    num_classes = w_out.shape[0]
    c_pad = _round_up(num_classes, _LANES)

    w1 = jnp.asarray(w_dense).T.astype(weight_dtype)                 # [in, inner]
    w2 = jnp.zeros((inner_dim, c_pad), weight_dtype).at[:, :num_classes].set(
        jnp.asarray(w_out).T.astype(weight_dtype))                   # [inner, Cp]
    b1 = jnp.asarray(b_dense).reshape(1, inner_dim).astype(jnp.float32)
    b2 = jnp.zeros((1, c_pad), jnp.float32).at[0, :num_classes].set(
        jnp.asarray(b_out).astype(jnp.float32))

    tanh_dtype = _pick_tanh_dtype(weight_dtype)

    @jax.jit
    def forward(features):
        b, d = features.shape
        assert d == input_dim, f"expected input_dim={input_dim}, got {d}"
        tb, bp = _choose_batch_tiling(b, batch_tile)
        n_i = bp // tb
        n_k = _choose_k_split(input_dim, n_i)
        x = features
        if bp != b:
            x = jnp.pad(x, ((0, bp - b), (0, 0)))
        out = _pallas_forward(x, w1, b1, w2, b2, tb=tb, n_k=n_k,
                              tanh_dtype=tanh_dtype, out_dtype=out_dtype)
        return out[:b, :num_classes]

    return forward


def _reference(features, w_dense, b_dense, w_out, b_out,
               weight_dtype=jnp.bfloat16):
    """Pure-JAX reference matching the kernel numerics (bf16 operands,
    f32 accumulation)."""
    f32 = jnp.float32
    x = features.astype(weight_dtype).astype(f32)
    w1 = w_dense.astype(weight_dtype).astype(f32)
    w2 = w_out.astype(weight_dtype).astype(f32)
    h = jnp.tanh(x @ w1.T + b_dense.astype(f32))
    h = h.astype(weight_dtype).astype(f32)
    return h @ w2.T + b_out.astype(f32)


if __name__ == "__main__":
    key = jax.random.PRNGKey(0)
    ks = jax.random.split(key, 10)

    # Small shapes consistent with the module (one pooled feature per sentence).
    input_dim, inner_dim, num_classes = 32, 32, 8
    w_dense = jax.random.normal(ks[0], (inner_dim, input_dim), jnp.float32) * 0.1
    b_dense = jax.random.normal(ks[1], (inner_dim,), jnp.float32) * 0.1
    w_out = jax.random.normal(ks[2], (num_classes, inner_dim), jnp.float32) * 0.1
    b_out = jax.random.normal(ks[3], (num_classes,), jnp.float32) * 0.1
    head = make_bart_classification_head(w_dense, b_dense, w_out, b_out)

    def check(feats, hd, wd, bd, wo, bo, nc):
        out = jax.block_until_ready(hd(feats))
        ref = _reference(feats, wd, bd, wo, bo)
        assert out.shape == (feats.shape[0], nc), out.shape
        err = float(jnp.max(jnp.abs(out - ref)))
        assert jnp.allclose(out, ref, atol=2e-2, rtol=2e-2), err

    # single tile, resident weights
    check(jax.random.normal(ks[4], (8, input_dim), jnp.float32),
          head, w_dense, b_dense, w_out, b_out, num_classes)
    # batch-padding path
    check(jax.random.normal(ks[5], (10, input_dim), jnp.float32),
          head, w_dense, b_dense, w_out, b_out, num_classes)
    # multi-tile path (grid > 1 along the "parallel" batch axis)
    check(jax.random.normal(ks[6], (300, input_dim), jnp.float32),
          head, w_dense, b_dense, w_out, b_out, num_classes)

    # K-split serving path (single batch tile, w1 streamed along input_dim).
    in2, inner2, nc2 = 256, 64, 4
    w_dense2 = jax.random.normal(ks[7], (inner2, in2), jnp.float32) * 0.05
    b_dense2 = jax.random.normal(ks[8], (inner2,), jnp.float32) * 0.05
    w_out2 = jax.random.normal(ks[9], (nc2, inner2), jnp.float32) * 0.05
    b_out2 = jnp.zeros((nc2,), jnp.float32)
    head2 = make_bart_classification_head(w_dense2, b_dense2, w_out2, b_out2)
    check(jax.random.normal(ks[4], (16, in2), jnp.float32),
          head2, w_dense2, b_dense2, w_out2, b_out2, nc2)

    print("KERNEL_OK")
</pallas_src>

<mosaic_0001>
module attributes {stable_mosaic.version = 11 : i64} {
  func.func @_cls_head_kernel(%arg0: i32, %arg1: i32, %arg2: memref<16x32xf32, #tpu.memory_space<vmem>>, %arg3: memref<32x32xbf16, #tpu.memory_space<vmem>>, %arg4: memref<1x32xf32, #tpu.memory_space<vmem>>, %arg5: memref<32x128xbf16, #tpu.memory_space<vmem>>, %arg6: memref<1x128xf32, #tpu.memory_space<vmem>>, %arg7: memref<16x128xf32, #tpu.memory_space<vmem>>) attributes {dimension_semantics = [#tpu.dimension_semantics<parallel>, #tpu.dimension_semantics<arbitrary>], iteration_bounds = array<i64: 1, 1>, scalar_prefetch = 0 : i64, scratch_operands = 0 : i64, tpu.core_type = #tpu.core_type<tc>, window_params = [{transform_indices = @transform_0, window_bounds = array<i64: 16, 32>}, {pipeline_mode = #tpu.pipeline_mode<synchronous>, transform_indices = @transform_1, window_bounds = array<i64: 32, 32>}, {pipeline_mode = #tpu.pipeline_mode<synchronous>, transform_indices = @transform_2, window_bounds = array<i64: 1, 32>}, {pipeline_mode = #tpu.pipeline_mode<synchronous>, transform_indices = @transform_3, window_bounds = array<i64: 32, 128>}, {pipeline_mode = #tpu.pipeline_mode<synchronous>, transform_indices = @transform_4, window_bounds = array<i64: 1, 128>}, {transform_indices = @transform_5, window_bounds = array<i64: 16, 128>}]} {
    %c0 = arith.constant 0 : index
    %c0_0 = arith.constant 0 : index
    %0 = vector.load %arg2[%c0, %c0_0] : memref<16x32xf32, #tpu.memory_space<vmem>>, vector<16x32xf32>
    %1 = arith.truncf %0 : vector<16x32xf32> to vector<16x32xbf16>
    %c0_1 = arith.constant 0 : index
    %c0_2 = arith.constant 0 : index
    %2 = vector.load %arg3[%c0_1, %c0_2] : memref<32x32xbf16, #tpu.memory_space<vmem>>, vector<32x32xbf16>
    %cst = arith.constant dense<0.000000e+00> : vector<16x32xf32>
    %3 = tpu.matmul %1, %2, %cst {dimension_numbers = #tpu.dot_dimension_numbers<[1], [0], [0], [1], [0, 0, 1, 1], [], []>} : vector<16x32xbf16>, vector<32x32xbf16>, vector<16x32xf32> -> vector<16x32xf32>
    %c0_3 = arith.constant 0 : index
    %c0_4 = arith.constant 0 : index
    %4 = vector.load %arg4[%c0_3, %c0_4] : memref<1x32xf32, #tpu.memory_space<vmem>>, vector<1x32xf32>
    %5 = vector.broadcast %4 : vector<1x32xf32> to vector<16x32xf32>
    %6 = arith.addf %3, %5 : vector<16x32xf32>
    %7 = math.tanh %6 : vector<16x32xf32>
    %8 = arith.truncf %7 : vector<16x32xf32> to vector<16x32xbf16>
    %c0_5 = arith.constant 0 : index
    %c0_6 = arith.constant 0 : index
    %9 = vector.load %arg5[%c0_5, %c0_6] : memref<32x128xbf16, #tpu.memory_space<vmem>>, vector<32x128xbf16>
    %cst_7 = arith.constant dense<0.000000e+00> : vector<16x128xf32>
    %10 = tpu.matmul %8, %9, %cst_7 {dimension_numbers = #tpu.dot_dimension_numbers<[1], [0], [0], [1], [0, 0, 1, 1], [], []>} : vector<16x32xbf16>, vector<32x128xbf16>, vector<16x128xf32> -> vector<16x128xf32>
    %c0_8 = arith.constant 0 : index
    %c0_9 = arith.constant 0 : index
    %11 = vector.load %arg6[%c0_8, %c0_9] : memref<1x128xf32, #tpu.memory_space<vmem>>, vector<1x128xf32>
    %12 = vector.broadcast %11 : vector<1x128xf32> to vector<16x128xf32>
    %13 = arith.addf %10, %12 : vector<16x128xf32>
    %c0_10 = arith.constant 0 : index
    %c0_11 = arith.constant 0 : index
    %14 = vector.load %arg7[%c0_10, %c0_11] : memref<16x128xf32, #tpu.memory_space<vmem>>, vector<16x128xf32>
    tpu.vector_store %arg7[%c0_10, %c0_11], %13 {strides = array<i32>} : memref<16x128xf32, #tpu.memory_space<vmem>>, vector<16x128xf32>,
    return
  }
  func.func @transform_0(%arg0: i32, %arg1: i32) -> (i32, i32) {
    %c0_i32 = arith.constant 0 : i32
    return %arg0, %arg1 : i32, i32
  }
  func.func @transform_1(%arg0: i32, %arg1: i32) -> (i32, i32) {
    %c0_i32 = arith.constant 0 : i32
    %c0_i32_0 = arith.constant 0 : i32
    return %arg1, %c0_i32 : i32, i32
  }
  func.func @transform_2(%arg0: i32, %arg1: i32) -> (i32, i32) {
    %c0_i32 = arith.constant 0 : i32
    %c0_i32_0 = arith.constant 0 : i32
    %c0_i32_1 = arith.constant 0 : i32
    return %c0_i32, %c0_i32_0 : i32, i32
  }
  func.func @transform_3(%arg0: i32, %arg1: i32) -> (i32, i32) {
    %c0_i32 = arith.constant 0 : i32
    %c0_i32_0 = arith.constant 0 : i32
    %c0_i32_1 = arith.constant 0 : i32
    return %c0_i32, %c0_i32_0 : i32, i32
  }
  func.func @transform_4(%arg0: i32, %arg1: i32) -> (i32, i32) {
    %c0_i32 = arith.constant 0 : i32
    %c0_i32_0 = arith.constant 0 : i32
    %c0_i32_1 = arith.constant 0 : i32
    return %c0_i32, %c0_i32_0 : i32, i32
  }
  func.func @transform_5(%arg0: i32, %arg1: i32) -> (i32, i32) {
    %c0_i32 = arith.constant 0 : i32
    %c0_i32_0 = arith.constant 0 : i32
    return %arg0, %c0_i32 : i32, i32
  }
}

</mosaic_0001>

<bundles_post_ra>
// kernel: forward.1
= control target key start
LH: loop header
LB: loop body
LE: loop exit
PB: predicated region body
PF: predicated region fallthrough
CT: control target
= control target key end

     0   :  { %v208_v0 = vmov 0.0   ;;  %vm209_vm0 = vmmov 0   ;;  %vm47_vm1 = vcmask 261120   ;;  %s272_s1 = inlined_call_operand.vmem [shape: bf16[32,32], index: 1, kind: input, shape index: {}]   ;;  %s273_s0 = inlined_call_operand.vmem [shape: f32[16,32], index: 0, kind: input, shape index: {}]   ;;  %s274_s3 = inlined_call_operand.vmem [shape: bf16[32,128], index: 3, kind: input, shape index: {}]   ;;  %s275_s2 = inlined_call_operand.vmem [shape: f32[1,32], index: 2, kind: input, shape index: {}]   ;;  %s276_s4 = inlined_call_operand.vmem [shape: f32[1,128], index: 4, kind: input, shape index: {}]   ;;  %s277_s5 = inlined_call_operand.vmem [shape: f32[16,128], index: 5, kind: output, shape index: {}]  }
   0x1   :  { %182 = vmatprep.subr.bf16.mxu0 %v208_v0  ;;  %v200_v1 = vld [vmem:[%s272_s1] sm:$0xff]   ;;  %186 = vmatprep.mubr.msk.bf16.mxu0 %vm209_vm0, %v208_v0  ;;  %v201_v2 = vld [vmem:[%s272_s1 + $0x8] sm:$0xff]  }
   0x2   :  { %190 = vmatprep.subr.bf16.mxu1 %v208_v0  ;;  %194 = vmatprep.mubr.msk.bf16.mxu1 %vm209_vm0, %v208_v0  ;;  %v21_v3 = vld [vmem:[%s273_s0] sm:$0xff]  ;;  %v22_v4 = vld [vmem:[%s273_s0 + $0x8] sm:$0xff] }
   0x3   :  { %183 = vmatpush3.bf16.msra.mxu0 %v200_v1  ;;  %v23_v5 = vpack.c.bf16 %v22_v4, %v21_v3  ;;  %v202_v6 = vld [vmem:[%s274_s3] sm:$0xff]   ;;  %v203_v7 = vld [vmem:[%s274_s3 + $0x8] sm:$0xff]  }
   0x4   :  { %184 = vmatprep.subr.bf16.mxu0 %v208_v0  ;;  %191 = vmatpush3.bf16.msra.mxu1 %v202_v6  ;;  %v168_v8 = vld [vmem:[%s275_s2] ss:$0 sm:$0xff] }
   0x5   :  { %192 = vmatprep.subr.bf16.mxu1 %v208_v0  ;;  %v172_v18 = vld [vmem:[%s276_s4] ss:$0 sm:$0xff] }
   0x7   :  { %185 = vmatpush3.bf16.msra.mxu0 %v201_v2 }
   0x8   :  { %193 = vmatpush3.bf16.msra.mxu1 %v203_v7 }
   0xa   :  { %187 = vmatmul.mubr.msk.bf16.vlgmr.msra.gmra.mrb[0].mxu0 %vm47_vm1, %v23_v5 }
  0xdd   :  { %v85_v9 = vpop.f32.mrb[0].mxu0 }
  0xde   :  { %v86_v10 = vadd.f32 %v168_v8, %v85_v9  ;;  %v188_v11 = vpop.f32.mrb[1].mxu0 }
  0xdf   :  { %v88_v12 = vpop.f32.mrb[2].mxu0 }
  0xe0   :  { %v89_v13 = vadd.f32 %v168_v8, %v88_v12  ;;  %v189_v14 = vpop.f32.mrb[3].mxu0  ;;  %204 = vtanh.f32 %v86_v10 }
  0xe2   :  { %206 = vtanh.f32 %v89_v13 }
  0xea   :  { %v205_v15 = vpop.eup %204 }
  0xec   :  { %v207_v16 = vpop.eup %206 }
  0xed   :  { %v94_v17 = vpack.c.bf16 %v207_v16, %v205_v15 }
  0xef   :  { %195 = vmatmul.mubr.msk.bf16.vlgmr.msra.gmra.mrb[0].mxu1 %vm47_vm1, %v94_v17 }
 0x1c2   :  { %v155_v19 = vpop.f32.mrb[0].mxu1 }
 0x1c3   :  { %v156_v20 = vadd.f32 %v172_v18, %v155_v19  ;;  %v196_v21 = vpop.f32.mrb[1].mxu1 }
 0x1c4   :  { %v158_v22 = vpop.f32.mrb[2].mxu1 }
 0x1c5   :  { %162 = vst [vmem:[%s277_s5] sm:$0xff] %v156_v20  ;;  %v159_v23 = vadd.f32 %v172_v18, %v158_v22  ;;  %v197_v24 = vpop.f32.mrb[3].mxu1 }
 0x1c7   :  { %163 = vst [vmem:[%s277_s5 + $0x8] sm:$0xff] %v159_v23 }

</bundles_post_ra>
